<compile_context>
chip_gen: v6e
topology: v6e:2x2x1
jax: 0.10.0
libtpu: 0.0.40
codegen_flags: <defaults>
</compile_context>

<pallas_src>
import functools

import jax
import jax.numpy as jnp
from jax.experimental import pallas as pl
from jax.experimental.pallas import tpu as pltpu


def _round_up(x, m):
    return (x + m - 1) // m * m


def translator_kernel(x_ref, w1_ref, b1_ref, w2_ref, b2_ref, o_ref, *, use_bf16):
    x = x_ref[...]
    w1 = w1_ref[...]
    w2 = w2_ref[...]
    if use_bf16:
        x = x.astype(jnp.bfloat16)
        w1 = w1.astype(jnp.bfloat16)
        w2 = w2.astype(jnp.bfloat16)

    # Layer 1 on the MXU: (tile, D) @ (D, H) -> (tile, H), f32 accumulate.
    h = jnp.dot(x, w1, preferred_element_type=jnp.float32)
    # Bias + ReLU on the VPU (bias is a (1, H) row, broadcasts over rows).
    h = jnp.maximum(h + b1_ref[...], 0.0)

    h_in = h.astype(jnp.bfloat16) if use_bf16 else h
    # Layer 2 on the MXU, keeping an f32 accumulator.
    y = jnp.dot(h_in, w2, preferred_element_type=jnp.float32)
    o_ref[...] = (y + b2_ref[...]).astype(o_ref.dtype)


def translator_forward(x, w1, b1, w2, b2, *, tile_n=256, min_steps=1,
                       use_bf16=False, vmem_limit_bytes=32 * 1024 * 1024):
    """x: (N, D); w1: (D, H); b1: (H,); w2: (H, D); b2: (D,). Returns (N, D).

    min_steps: set to 2 on v7x (2 TensorCores) so the row-parallel grid axis
    can be sharded across both cores when the batch is large enough.
    """
    N, D = x.shape
    H = w1.shape[1]

    # Biases viewed as (1, F) rows for in-kernel broadcast (metadata-only).
    b1_2d = b1.reshape(1, H)
    b2_2d = b2.reshape(1, D)

    # Balanced row tiling: no row padding, ragged tail handled by Pallas.
    steps = max(min_steps, pl.cdiv(N, tile_n))
    steps = min(steps, pl.cdiv(N, 8))            # never go below 8-row tiles
    tile = _round_up(pl.cdiv(N, steps), 8)
    grid = (pl.cdiv(N, tile),)

    itemsize = jnp.dtype(x.dtype).itemsize
    cost = pl.CostEstimate(
        flops=4 * N * D * H,                      # two matmuls, 2*M*K*N each
        transcendentals=0,
        bytes_accessed=(N * D * 2                 # x in + y out
                        + D * H * 2               # W1 + W2
                        + H + D) * itemsize,      # biases
    )

    kernel = functools.partial(translator_kernel, use_bf16=use_bf16)

    return pl.pallas_call(
        kernel,
        out_shape=jax.ShapeDtypeStruct((N, D), x.dtype),
        grid_spec=pltpu.PrefetchScalarGridSpec(
            num_scalar_prefetch=0,
            grid=grid,
            in_specs=[
                # x: tile over rows; lane axis is the full array dim D.
                pl.BlockSpec((tile, D), lambda i: (i, 0)),
                # Weights / biases: whole (tiny) arrays, resident across steps.
                pl.BlockSpec((D, H), lambda i: (0, 0)),
                pl.BlockSpec((1, H), lambda i: (0, 0)),
                pl.BlockSpec((H, D), lambda i: (0, 0)),
                pl.BlockSpec((1, D), lambda i: (0, 0)),
            ],
            out_specs=pl.BlockSpec((tile, D), lambda i: (i, 0)),
        ),
        compiler_params=pltpu.CompilerParams(
            dimension_semantics=("parallel",),
            vmem_limit_bytes=vmem_limit_bytes,
        ),
        cost_estimate=cost,
    )(x, w1, b1_2d, w2, b2_2d)


def translator_reference(x, w1, b1, w2, b2):
    h = jnp.maximum(x @ w1 + b1, 0.0)
    return h @ w2 + b2


if __name__ == "__main__":
    key = jax.random.PRNGKey(0)
    kx, kw1, kb1, kw2, kb2, kx2 = jax.random.split(key, 6)

    # Small shapes consistent with the module: batch=8, dimension=32, hidden=64.
    N, D, H = 8, 32, 64

    x = jax.random.normal(kx, (N, D), dtype=jnp.float32)

    # Deterministic parameter init (mimicking nn.Linear's uniform fan-in init).
    lim1 = 1.0 / (D ** 0.5)
    lim2 = 1.0 / (H ** 0.5)
    w1 = jax.random.uniform(kw1, (D, H), minval=-lim1, maxval=lim1,
                            dtype=jnp.float32)   # = PyTorch W1.T
    b1 = jax.random.uniform(kb1, (H,), minval=-lim1, maxval=lim1,
                            dtype=jnp.float32)
    w2 = jax.random.uniform(kw2, (H, D), minval=-lim2, maxval=lim2,
                            dtype=jnp.float32)   # = PyTorch W2.T
    b2 = jax.random.uniform(kb2, (D,), minval=-lim2, maxval=lim2,
                            dtype=jnp.float32)

    # Case 1: tiny batch — single grid step, tile clamps to 8 rows.
    out = jax.block_until_ready(translator_forward(x, w1, b1, w2, b2))
    ref = translator_reference(x, w1, b1, w2, b2)
    assert out.shape == (N, D)
    assert jnp.allclose(out, ref, atol=1e-5, rtol=1e-5), "mismatch vs reference (small)"

    # Case 2: ragged multi-tile batch — balanced tiles, no row padding,
    # ragged tail rows discarded by the clipped write-back.
    N2 = 300
    x2 = jax.random.normal(kx2, (N2, D), dtype=jnp.float32)
    out2 = jax.block_until_ready(
        translator_forward(x2, w1, b1, w2, b2, tile_n=128))
    ref2 = translator_reference(x2, w1, b1, w2, b2)
    assert out2.shape == (N2, D)
    assert jnp.allclose(out2, ref2, atol=1e-5, rtol=1e-5), "mismatch vs reference (tiled)"

    # Case 3: same batch, min_steps=2 (v7x-style 2-TensorCore split) — checks
    # that the balanced-tile path with >=2 parallel steps is still exact.
    out3 = jax.block_until_ready(
        translator_forward(x2, w1, b1, w2, b2, min_steps=2))
    assert jnp.allclose(out3, ref2, atol=1e-5, rtol=1e-5), "mismatch vs reference (2-core)"

    print("KERNEL_OK")
</pallas_src>

<mosaic_0001>
module attributes {stable_mosaic.version = 11 : i64} {
  func.func @translator_kernel(%arg0: i32, %arg1: memref<8x32xf32, #tpu.memory_space<vmem>>, %arg2: memref<32x64xf32, #tpu.memory_space<vmem>>, %arg3: memref<1x64xf32, #tpu.memory_space<vmem>>, %arg4: memref<64x32xf32, #tpu.memory_space<vmem>>, %arg5: memref<1x32xf32, #tpu.memory_space<vmem>>, %arg6: memref<8x32xf32, #tpu.memory_space<vmem>>) attributes {dimension_semantics = [#tpu.dimension_semantics<parallel>], iteration_bounds = array<i64: 1>, scalar_prefetch = 0 : i64, scratch_operands = 0 : i64, tpu.core_type = #tpu.core_type<tc>, window_params = [{transform_indices = @transform_0, window_bounds = array<i64: 8, 32>}, {pipeline_mode = #tpu.pipeline_mode<synchronous>, transform_indices = @transform_1, window_bounds = array<i64: 32, 64>}, {pipeline_mode = #tpu.pipeline_mode<synchronous>, transform_indices = @transform_2, window_bounds = array<i64: 1, 64>}, {pipeline_mode = #tpu.pipeline_mode<synchronous>, transform_indices = @transform_3, window_bounds = array<i64: 64, 32>}, {pipeline_mode = #tpu.pipeline_mode<synchronous>, transform_indices = @transform_4, window_bounds = array<i64: 1, 32>}, {transform_indices = @transform_5, window_bounds = array<i64: 8, 32>}]} {
    %c0 = arith.constant 0 : index
    %c0_0 = arith.constant 0 : index
    %0 = vector.load %arg1[%c0, %c0_0] : memref<8x32xf32, #tpu.memory_space<vmem>>, vector<8x32xf32>
    %c0_1 = arith.constant 0 : index
    %c0_2 = arith.constant 0 : index
    %1 = vector.load %arg2[%c0_1, %c0_2] : memref<32x64xf32, #tpu.memory_space<vmem>>, vector<32x64xf32>
    %c0_3 = arith.constant 0 : index
    %c0_4 = arith.constant 0 : index
    %2 = vector.load %arg4[%c0_3, %c0_4] : memref<64x32xf32, #tpu.memory_space<vmem>>, vector<64x32xf32>
    %cst = arith.constant dense<0.000000e+00> : vector<8x64xf32>
    %3 = tpu.matmul %0, %1, %cst {dimension_numbers = #tpu.dot_dimension_numbers<[1], [0], [0], [1], [0, 0, 1, 1], [], []>} : vector<8x32xf32>, vector<32x64xf32>, vector<8x64xf32> -> vector<8x64xf32>
    %c0_5 = arith.constant 0 : index
    %c0_6 = arith.constant 0 : index
    %4 = vector.load %arg3[%c0_5, %c0_6] : memref<1x64xf32, #tpu.memory_space<vmem>>, vector<1x64xf32>
    %5 = vector.broadcast %4 : vector<1x64xf32> to vector<8x64xf32>
    %6 = arith.addf %3, %5 : vector<8x64xf32>
    %cst_7 = arith.constant 0.000000e+00 : f32
    %7 = vector.broadcast %cst_7 : f32 to vector<8x64xf32>
    %8 = arith.maximumf %6, %7 : vector<8x64xf32>
    %cst_8 = arith.constant dense<0.000000e+00> : vector<8x32xf32>
    %9 = tpu.matmul %8, %2, %cst_8 {dimension_numbers = #tpu.dot_dimension_numbers<[1], [0], [0], [1], [0, 0, 1, 1], [], []>} : vector<8x64xf32>, vector<64x32xf32>, vector<8x32xf32> -> vector<8x32xf32>
    %c0_9 = arith.constant 0 : index
    %c0_10 = arith.constant 0 : index
    %10 = vector.load %arg5[%c0_9, %c0_10] : memref<1x32xf32, #tpu.memory_space<vmem>>, vector<1x32xf32>
    %11 = vector.broadcast %10 : vector<1x32xf32> to vector<8x32xf32>
    %12 = arith.addf %9, %11 : vector<8x32xf32>
    %c0_11 = arith.constant 0 : index
    %c0_12 = arith.constant 0 : index
    %13 = vector.load %arg6[%c0_11, %c0_12] : memref<8x32xf32, #tpu.memory_space<vmem>>, vector<8x32xf32>
    tpu.vector_store %arg6[%c0_11, %c0_12], %12 {strides = array<i32>} : memref<8x32xf32, #tpu.memory_space<vmem>>, vector<8x32xf32>,
    return
  }
  func.func @transform_0(%arg0: i32) -> (i32, i32) {
    %c0_i32 = arith.constant 0 : i32
    %c0_i32_0 = arith.constant 0 : i32
    return %arg0, %c0_i32 : i32, i32
  }
  func.func @transform_1(%arg0: i32) -> (i32, i32) {
    %c0_i32 = arith.constant 0 : i32
    %c0_i32_0 = arith.constant 0 : i32
    %c0_i32_1 = arith.constant 0 : i32
    return %c0_i32, %c0_i32_0 : i32, i32
  }
  func.func @transform_2(%arg0: i32) -> (i32, i32) {
    %c0_i32 = arith.constant 0 : i32
    %c0_i32_0 = arith.constant 0 : i32
    %c0_i32_1 = arith.constant 0 : i32
    return %c0_i32, %c0_i32_0 : i32, i32
  }
  func.func @transform_3(%arg0: i32) -> (i32, i32) {
    %c0_i32 = arith.constant 0 : i32
    %c0_i32_0 = arith.constant 0 : i32
    %c0_i32_1 = arith.constant 0 : i32
    return %c0_i32, %c0_i32_0 : i32, i32
  }
  func.func @transform_4(%arg0: i32) -> (i32, i32) {
    %c0_i32 = arith.constant 0 : i32
    %c0_i32_0 = arith.constant 0 : i32
    %c0_i32_1 = arith.constant 0 : i32
    return %c0_i32, %c0_i32_0 : i32, i32
  }
  func.func @transform_5(%arg0: i32) -> (i32, i32) {
    %c0_i32 = arith.constant 0 : i32
    %c0_i32_0 = arith.constant 0 : i32
    return %arg0, %c0_i32 : i32, i32
  }
}

</mosaic_0001>

<bundles_post_ra>
// kernel: tpu_custom_call.1
= control target key start
LH: loop header
LB: loop body
LE: loop exit
PB: predicated region body
PF: predicated region fallthrough
CT: control target
= control target key end

     0   :  { %v285_v1 = vmov 0.0   ;;  %vm286_vm0 = vmmov 0   ;;  %s370_s0 = inlined_call_operand.vmem [shape: f32[8,32], index: 0, kind: input, shape index: {}]   ;;  %s371_s1 = inlined_call_operand.vmem [shape: f32[32,64], index: 1, kind: input, shape index: {}]   ;;  %s372_s2 = inlined_call_operand.vmem [shape: f32[1,64], index: 2, kind: input, shape index: {}]   ;;  %s373_s3 = inlined_call_operand.vmem [shape: f32[64,32], index: 3, kind: input, shape index: {}]   ;;  %s374_s4 = inlined_call_operand.vmem [shape: f32[1,32], index: 4, kind: input, shape index: {}]   ;;  %s375_s5 = inlined_call_operand.hbm [shape: f32[8,32], index: 5, kind: output, shape index: {}]  }
   0x1   :  { %v25_v0 = vld [vmem:[%s371_s1 + $0x18] sm:$0xff]  ;;  %230 = vmatprep.subr.mxu0 %v285_v1  ;;  %v24_v2 = vld [vmem:[%s371_s1 + $0x10] sm:$0xff]  ;;  %238 = vmatprep.mubr.msk.f32.mxu0 %vm286_vm0, %v285_v1  ;;  %v23_v5 = vld [vmem:[%s371_s1 + $0x8] sm:$0xff] }
   0x2   :  { %v33_v3 = vld [vmem:[%s373_s3 + $0x38] sm:$0xff]  ;;  %231 = vmatpush3.msra.mxu0 %v25_v0  ;;  %241 = vmatprep.subr.mxu1 %v285_v1  ;;  %v32_v4 = vld [vmem:[%s373_s3 + $0x30] sm:$0xff] }
   0x3   :  { %232 = vmatprep.subr.mxu0 %v285_v1  ;;  %242 = vmatpush3.msra.mxu1 %v33_v3 }
   0x4   :  { %10 = vsyncpa [#allocation3], 0  ;;  %233 = vmatpush3.msra.mxu0 %v24_v2  ;;  %243 = vmatprep.subr.mxu1 %v285_v1  ;;  %v31_v6 = vld [vmem:[%s373_s3 + $0x28] sm:$0xff]  ;;  %v22_v7 = vld [vmem:[%s371_s1] sm:$0xff]  ;;  %vm41_vm1 = vcmask 261120   ;;  %vm123_vm2 = vcmask 523264  }
   0x5   :  { %234 = vmatprep.subr.mxu0 %v285_v1  ;;  %244 = vmatpush3.msra.mxu1 %v32_v4  ;;  %v21_v8 = vld [vmem:[%s370_s0] sm:$0xff]  ;;  %v29_v10 = vld [vmem:[%s373_s3 + $0x18] sm:$0xff]  ;;  %v28_v11 = vld [vmem:[%s373_s3 + $0x10] sm:$0xff]  ;;  %s287_s21 = smov [#allocation2]  }
   0x6   :  { %235 = vmatpush3.msra.mxu0 %v23_v5  ;;  %245 = vmatprep.subr.mxu1 %v285_v1  ;;  %v30_v9 = vld [vmem:[%s373_s3 + $0x20] sm:$0xff]  ;;  %v27_v12 = vld [vmem:[%s373_s3 + $0x8] sm:$0xff]  ;;  %s204_s22 = sshll.u32 %s287_s21, 4  ;;  %s205_s22 = int_to_ptr.vmem [resolvable:$true] %s204_s22 }
   0x7   :  { %236 = vmatprep.subr.mxu0 %v285_v1  ;;  %246 = vmatpush3.msra.mxu1 %v31_v6  ;;  %v26_v13 = vld [vmem:[%s373_s3] sm:$0xff]  ;;  %s263_s3 = scalar_lea.vmem %s205_s22, 128  ;;  %p268_p1 = scmp.lt.s32.totalorder %s205_s22, %s205_s22 }
   0x8   :  { %237 = vmatpush3.msra.mxu0 %v22_v7  ;;  %247 = vmatprep.subr.mxu1 %v285_v1  ;;  %v212_v14 = vld [vmem:[%s372_s2] ss:$0 sm:$0xff]  ;;  %p264_p0 = scmp.ne.s32.totalorder %s205_s22, %s263_s3  ;;  %p269_p2 = scmp.lt.s32.totalorder %s263_s3, %s263_s3 }
   0x9   :  { %239 = vmatmul.mubr.msk.f32.vlgmr.msra.gmra.mxu0 %vm41_vm1, %v21_v8  ;;  %248 = vmatpush3.msra.mxu1 %v30_v9  ;;  %v214_v19 = vld [vmem:[%s374_s4] ss:$0 sm:$0xff] }
   0xa   :  { %249 = vmatprep.subr.mxu1 %v285_v1  ;;  %257 = vmatprep.mubr.msk.f32.mxu1 %vm286_vm0, %v285_v1  ;;  %p270_p3 = por %p269_p2, %p268_p1 }
   0xb   :  { %250 = vmatpush3.msra.mxu1 %v29_v10 }
   0xc   :  { %251 = vmatprep.subr.mxu1 %v285_v1  ;;  %p271_p4 = pnand %p270_p3, %p264_p0 }
   0xd   :  { %252 = vmatpush3.msra.mxu1 %v28_v11 }
   0xe   :  { %253 = vmatprep.subr.mxu1 %v285_v1 }
   0xf   :  { %254 = vmatpush3.msra.mxu1 %v27_v12 }
  0x10   :  { %255 = vmatprep.subr.mxu1 %v285_v1 }
  0x11   :  { %256 = vmatpush3.msra.mxu1 %v26_v13 }
  0xc9   :  { %v111_v15 = vpop.f32.mrf.mxu0 }
  0xca   :  { %v112_v16 = vadd.f32 %v212_v14, %v111_v15 }
  0xcb   :  { %v240_v17 = vpop.f32.mrf.mxu0 }
  0xcc   :  { %v115_v18 = vmax.f32 %v112_v16, 0.0 }
  0xce   :  { %258 = vmatmul.mubr.msk.f32.vlgmr.msra.gmra.mxu1 %vm123_vm2, %v115_v18 }
 0x18e   :  { %v193_v20 = vpop.f32.mrf.mxu1 }
 0x18f   :  { %v194_v21 = vadd.f32 %v214_v19, %v193_v20 }
 0x190   :  { %v259_v22 = vpop.f32.mrf.mxu1 }
 0x191   :  { %197 = vst.msk [vmem:[#allocation2] sm:$0xff] %vm41_vm1, %v194_v21 }
 0x192   :  { %274 = shalt.err (!%p271_p4)
}
 0x193   :  { %207 = dma.vmem_to_hbm [thread:$0]  %s205_s22, 128, %s375_s5, [#allocation3]  }
 0x194   :  { %283 = dma.done.wait [#allocation3], 128  }
 0x195   :  { %284 = vsyncadd [#allocation3], 4294967168 }
 0x196   :  { %211 = vsyncpa [#allocation3], 1 }

</bundles_post_ra>
